<compile_context>
chip_gen: v7x
topology: tpu7x:2x2x1
jax: 0.10.0
libtpu: 0.0.40
codegen_flags: <defaults>
</compile_context>

<pallas_src>
import jax
import jax.numpy as jnp
from jax.experimental import pallas as pl
from jax.experimental.pallas import tpu as pltpu


def _alias_noop_kernel(x_hbm, o_hbm, flag_smem):
    # Output aliases the input buffer: the flattened bytes are already in
    # place, so the kernel performs no data movement at all.
    del x_hbm, o_hbm
    # Single SMEM scalar store keeps the lowered body non-empty.
    flag_smem[0] = jnp.int32(0)


def _hbm_to_hbm_copy_kernel(x_hbm, o_hbm, sem):
    # One whole-array HBM->HBM DMA: no VMEM staging, no per-tile overhead.
    # (Stays HBM-bandwidth-bound, but skips the VMEM bounce of the old
    # tiled pipeline and frees all scoped VMEM for neighboring fused ops.)
    cp = pltpu.make_async_copy(x_hbm, o_hbm, sem)
    cp.start()
    cp.wait()


def flatten(x, *, alias=True):
    """Pallas equivalent of Flatten.forward: [B, C, H, W] -> [B, C*H*W].

    alias=True  (default): zero-DMA path; output aliases the (reshaped) input.
    alias=False: caller needs `x` preserved as a distinct buffer; one direct
                 HBM->HBM DMA copy is issued instead.
    """
    B = x.shape[0]
    D = 1
    for s in x.shape[1:]:
        D *= s
    # Metadata-only reshape in the wrapper (bitcast for contiguous default
    # layout); the kernel sees a 2-D (B, D) HBM slab.
    x2 = x.reshape(B, D)
    out_shape = jax.ShapeDtypeStruct((B, D), x.dtype)

    if alias:
        return pl.pallas_call(
            _alias_noop_kernel,
            out_shape=out_shape,
            in_specs=[pl.BlockSpec(memory_space=pl.ANY)],
            out_specs=pl.BlockSpec(memory_space=pl.ANY),
            scratch_shapes=[pltpu.SMEM((1,), jnp.int32)],
            # Bytes are identical: output is the same HBM buffer as the input.
            input_output_aliases={0: 0},
        )(x2)

    return pl.pallas_call(
        _hbm_to_hbm_copy_kernel,
        out_shape=out_shape,
        in_specs=[pl.BlockSpec(memory_space=pl.ANY)],
        out_specs=pl.BlockSpec(memory_space=pl.ANY),
        scratch_shapes=[pltpu.SemaphoreType.DMA(())],
    )(x2)


# jit so the (bitcast) reshape + aliased pallas_call live in one XLA
# computation, letting XLA actually exploit the buffer alias / elide copies.
flatten_view = jax.jit(lambda x: flatten(x, alias=True))
flatten_copy = jax.jit(lambda x: flatten(x, alias=False))


if __name__ == "__main__":
    key = jax.random.PRNGKey(0)
    # Small shapes consistent with the module's NCHW contract.
    x = jax.random.normal(key, (2, 4, 16, 16), dtype=jnp.float32)

    # Reference semantics: torch.view(B, -1) == row-major reshape.
    ref = x.reshape(x.shape[0], -1)

    out_view = jax.block_until_ready(flatten_view(x))   # zero-DMA aliased path
    out_copy = jax.block_until_ready(flatten_copy(x))   # HBM->HBM DMA fallback

    for out in (out_view, out_copy):
        assert out.shape == (2, 4 * 16 * 16), out.shape
        assert out.dtype == x.dtype
        assert jnp.array_equal(out, ref), "mismatch vs reference flatten"

    print("KERNEL_OK")
</pallas_src>

<mosaic_0001>
module attributes {stable_mosaic.version = 11 : i64} {
  func.func @_alias_noop_kernel(%arg0: memref<2x1024xf32, #tpu.memory_space<any>>, %arg1: memref<2x1024xf32, #tpu.memory_space<any>>, %arg2: memref<1xi32, #tpu.memory_space<smem>>) attributes {dimension_semantics = [], scalar_prefetch = 0 : i64, scratch_operands = 1 : i64, tpu.core_type = #tpu.core_type<tc>} {
    %c0_i32 = arith.constant 0 : i32
    %c0 = arith.constant 0 : index
    %0 = memref.load %arg2[%c0] : memref<1xi32, #tpu.memory_space<smem>>
    memref.store %c0_i32, %arg2[%c0] : memref<1xi32, #tpu.memory_space<smem>>
    return
  }
}

</mosaic_0001>

<bundles_post_ra>
// kernel: _lambda_.1
= control target key start
LH: loop header
LB: loop body
LE: loop exit
PB: predicated region body
PF: predicated region fallthrough
CT: control target
= control target key end

     0   :  { %s18_s0 = inlined_call_operand.hbm [shape: f32[2,1024], index: 0, kind: input, shape index: {}, may-alias: {0,1}]   ;;  %s19_s1 = inlined_call_operand.hbm [shape: f32[2,1024], index: 1, kind: output, shape index: {}, may-alias: {0,1}]  }

</bundles_post_ra>
